<compile_context>
chip_gen: v5e
topology: v5e:2x2
jax: 0.10.0
libtpu: 0.0.40
codegen_flags: <defaults>
</compile_context>

<pallas_src>
import functools

import jax
import jax.numpy as jnp
from jax import lax
from jax.experimental import pallas as pl
from jax.experimental.pallas import tpu as pltpu


def _tied_lm_head_kernel(emb_ref, wte_ref, logits_ref):
    """One (row-tile i, vocab-tile j) grid step.

    emb_ref:    VMEM (tn, D)  bf16   gathered embeddings for row tile i
    wte_ref:    VMEM (tv, D)  bf16   vocab tile j of the embedding table
    logits_ref: VMEM (tn, tv)        output logits tile (bf16 by default)
    """
    # Tied LM head: logits_tile = emb @ wte_tile.T, expressed as dot_general
    # contracting D on both operands (no materialized transpose).
    # bf16 operands on the MXU, f32 accumulation, cast on store.
    logits_ref[...] = lax.dot_general(
        emb_ref[...], wte_ref[...],
        dimension_numbers=(((1,), (1,)), ((), ())),
        preferred_element_type=jnp.float32,
    ).astype(logits_ref.dtype)


def _vmem_budget_bytes():
    """Per-TensorCore VMEM budget for resident tiles (keep ~25% headroom)."""
    try:
        cap = int(pltpu.get_tpu_info().vmem_capacity_bytes)
    except Exception:
        cap = 64 << 20  # conservative fallback: v7x per-TensorCore VMEM
    return min(cap * 3 // 4, 100 << 20)


def _choose_tiles(n, v, d, out_bytes, budget):
    """Pick (tn, tv): tn amortizes the wte re-stream, tv fills the VMEM budget."""
    tn = None
    for cand in (1024, 512, 256, 128, 64, 32, 16, 8):
        if cand <= n and n % cand == 0:
            tn = cand
            break
    if tn is None:
        tn = n  # tiny / odd N: full-extent row block

    # Resident bytes: 2x emb tile + 2x wte tile + 2x logits tile (double buffered).
    emb_bytes = 2 * tn * d * 2
    per_tv = 2 * d * 2 + 2 * tn * out_bytes
    tv_fit = max((budget - emb_bytes) // per_tv, 0)

    tv = None
    cand = (min(tv_fit, v) // 128) * 128
    while cand >= 128:
        if v % cand == 0:
            tv = cand
            break
        cand -= 128
    if tv is None:
        tv = v  # no 128-multiple divisor fits / tiny vocab: full-extent block
    return tn, tv


@functools.partial(jax.jit, static_argnames=("tn", "tv", "logits_dtype"))
def _forward_impl(x, wte, *, tn, tv, logits_dtype):
    b, t = x.shape
    v, d = wte.shape
    n = b * t
    out_bytes = jnp.dtype(logits_dtype).itemsize

    # Cast only if needed (callers should keep the table in bf16 so decode
    # loops do not re-cast V*D every step).
    wte_bf16 = wte if wte.dtype == jnp.bfloat16 else wte.astype(jnp.bfloat16)

    # Embedding gather hoisted out of the kernel: one fused XLA gather;
    # out-of-range ids are clamped (wte[x]-like semantics).
    ids = x.reshape(n).astype(jnp.int32)
    emb = jnp.take(wte_bf16, ids, axis=0, mode="clip")  # (n, d) bf16

    grid = (n // tn, v // tv)

    cost = pl.CostEstimate(
        flops=2 * n * v * d,
        transcendentals=0,
        # gathered emb read + wte re-streamed once per row tile + logits write.
        bytes_accessed=n * d * 2 + (n // tn) * v * d * 2 + n * v * out_bytes,
    )

    # Double-buffered tile footprint; let the scoped VMEM limit track it.
    vmem_need = 2 * tn * d * 2 + 2 * tv * d * 2 + 2 * tn * tv * out_bytes
    vmem_limit = max(vmem_need + (4 << 20), 32 << 20)

    logits_flat = pl.pallas_call(
        _tied_lm_head_kernel,
        out_shape=jax.ShapeDtypeStruct((n, v), logits_dtype),
        grid_spec=pltpu.PrefetchScalarGridSpec(
            num_scalar_prefetch=0,
            grid=grid,
            in_specs=[
                # emb tile stays resident across the vocab axis (same block
                # index for every j).
                pl.BlockSpec((tn, d), lambda i, j: (i, 0)),
                # wte vocab tile streamed along j.
                pl.BlockSpec((tv, d), lambda i, j: (j, 0)),
            ],
            out_specs=pl.BlockSpec((tn, tv), lambda i, j: (i, j)),
        ),
        compiler_params=pltpu.CompilerParams(
            dimension_semantics=("parallel", "arbitrary"),
            vmem_limit_bytes=int(vmem_limit),
        ),
        cost_estimate=cost,
    )(emb, wte_bf16)

    return logits_flat.reshape(b, t, v)


def base_model_forward(x, wte, *, tn=None, tv=None, logits_dtype=jnp.bfloat16):
    """x: (B, T) int token ids; wte: (V, D). Returns (logits, None)."""
    b, t = x.shape
    v, d = wte.shape
    n = b * t
    out_bytes = jnp.dtype(logits_dtype).itemsize

    if tn is None or tv is None:
        auto_tn, auto_tv = _choose_tiles(n, v, d, out_bytes, _vmem_budget_bytes())
        tn = auto_tn if tn is None else tn
        tv = auto_tv if tv is None else tv
    assert n % tn == 0 and v % tv == 0, "tile sizes must divide (N, V)"
    assert tn == n or tn % 8 == 0, "tn must be a multiple of 8 (sublanes)"
    assert tv == v or tv % 128 == 0, "tv must be a multiple of 128 (lanes)"

    logits = _forward_impl(x, wte, tn=int(tn), tv=int(tv), logits_dtype=logits_dtype)
    return logits, None


def base_model_next_token_logits(x, wte, **kwargs):
    """Decode step: logits for the last position only (generate() reads [:, -1, :])."""
    logits, _ = base_model_forward(x[:, -1:], wte, **kwargs)
    return logits[:, -1, :]


if __name__ == "__main__":
    # Small deterministic config that still exercises the (row, vocab) grid:
    # batch=2, seq=16 (N=32 rows), d_vocab=512, d_embed=64; tiles (16, 128)
    # -> grid (2, 4).
    B, T, V, D = 2, 16, 512, 64
    TN, TV = 16, 128

    key = jax.random.PRNGKey(0)
    k_tok, k_wte = jax.random.split(key)

    x = jax.random.randint(k_tok, (B, T), 0, V, dtype=jnp.int32)
    # Table kept in bf16 (cast once, outside the forward / decode loop).
    wte = (jax.random.normal(k_wte, (V, D), dtype=jnp.float32) * 0.02).astype(jnp.bfloat16)

    logits, aux = base_model_forward(x, wte, tn=TN, tv=TV)
    logits = jax.block_until_ready(logits)
    assert aux is None
    assert logits.shape == (B, T, V)
    assert logits.dtype == jnp.bfloat16

    # Reference on the same bf16 table (f32 math) — isolates the kernel math.
    wte_f32 = wte.astype(jnp.float32)
    ref_logits = jnp.einsum("btd,vd->btv", wte_f32[x], wte_f32)
    max_err = float(jnp.max(jnp.abs(logits.astype(jnp.float32) - ref_logits)))
    assert max_err < 5e-3, max_err

    # Decode-step entry point (adaptive tiles): only the last position.
    next_logits = jax.block_until_ready(base_model_next_token_logits(x, wte))
    assert next_logits.shape == (B, V)
    assert jnp.allclose(next_logits.astype(jnp.float32),
                        logits[:, -1, :].astype(jnp.float32), atol=2e-3)

    # Greedy next-token step (mirrors one iteration of BaseModel.generate).
    next_tok = jnp.argmax(next_logits.astype(jnp.float32), axis=-1)
    jax.block_until_ready(next_tok)

    print("KERNEL_OK")
</pallas_src>

<mosaic_0001>
module attributes {stable_mosaic.version = 11 : i64} {
  func.func @_tied_lm_head_kernel(%arg0: i32, %arg1: i32, %arg2: memref<16x64xbf16, #tpu.memory_space<vmem>>, %arg3: memref<128x64xbf16, #tpu.memory_space<vmem>>, %arg4: memref<16x128xbf16, #tpu.memory_space<vmem>>) attributes {dimension_semantics = [#tpu.dimension_semantics<parallel>, #tpu.dimension_semantics<arbitrary>], iteration_bounds = array<i64: 2, 4>, scalar_prefetch = 0 : i64, scratch_operands = 0 : i64, tpu.core_type = #tpu.core_type<tc>, window_params = [{transform_indices = @transform_0, window_bounds = array<i64: 16, 64>}, {transform_indices = @transform_1, window_bounds = array<i64: 128, 64>}, {transform_indices = @transform_2, window_bounds = array<i64: 16, 128>}]} {
    %c0 = arith.constant 0 : index
    %c0_0 = arith.constant 0 : index
    %0 = vector.load %arg2[%c0, %c0_0] : memref<16x64xbf16, #tpu.memory_space<vmem>>, vector<16x64xbf16>
    %c0_1 = arith.constant 0 : index
    %c0_2 = arith.constant 0 : index
    %1 = vector.load %arg3[%c0_1, %c0_2] : memref<128x64xbf16, #tpu.memory_space<vmem>>, vector<128x64xbf16>
    %cst = arith.constant dense<0.000000e+00> : vector<16x128xf32>
    %2 = tpu.matmul %0, %1, %cst {dimension_numbers = #tpu.dot_dimension_numbers<[1], [1], [0], [0], [0, 0, 1, 0], [], []>} : vector<16x64xbf16>, vector<128x64xbf16>, vector<16x128xf32> -> vector<16x128xf32>
    %3 = arith.truncf %2 : vector<16x128xf32> to vector<16x128xbf16>
    %c0_3 = arith.constant 0 : index
    %c0_4 = arith.constant 0 : index
    %4 = vector.load %arg4[%c0_3, %c0_4] : memref<16x128xbf16, #tpu.memory_space<vmem>>, vector<16x128xbf16>
    tpu.vector_store %arg4[%c0_3, %c0_4], %3 {strides = array<i32>} : memref<16x128xbf16, #tpu.memory_space<vmem>>, vector<16x128xbf16>,
    return
  }
  func.func @transform_0(%arg0: i32, %arg1: i32) -> (i32, i32) {
    %c0_i32 = arith.constant 0 : i32
    %c0_i32_0 = arith.constant 0 : i32
    return %arg0, %c0_i32 : i32, i32
  }
  func.func @transform_1(%arg0: i32, %arg1: i32) -> (i32, i32) {
    %c0_i32 = arith.constant 0 : i32
    %c0_i32_0 = arith.constant 0 : i32
    return %arg1, %c0_i32 : i32, i32
  }
  func.func @transform_2(%arg0: i32, %arg1: i32) -> (i32, i32) {
    %c0_i32 = arith.constant 0 : i32
    return %arg0, %arg1 : i32, i32
  }
}

</mosaic_0001>

<bundles_post_ra>
// kernel: _forward_impl.1
= control target key start
LH: loop header
LB: loop body
LE: loop exit
PB: predicated region body
PF: predicated region fallthrough
CT: control target
= control target key end

     0   :  { %7 = vsyncpa [#allocation3], 0  ;;  %s783_s0 = inlined_call_operand.vmem [shape: bf16[32,64], index: 0, kind: input, shape index: {}]   ;;  %s784_s1 = inlined_call_operand.vmem [shape: bf16[512,64], index: 1, kind: input, shape index: {}]   ;;  %s785_s2 = inlined_call_operand.hbm [shape: bf16[32,512], index: 2, kind: output, shape index: {}]  }
   0x1   :  { %9 = vsyncpa [#allocation3 + $0x1], 0  ;;  %s651_s9 = smov 0   ;;  %s653_s10 = smov 0  }
   0x2   :  { %s655_s11 = smov 0   ;;  %s657_s12 = smov 0  }
   0x3   :  { %s659_s13 = smov 0   ;;  %s661_s14 = smov 0  }
   0x4   :  { %s663_s15 = smov 0   ;;  %s665_s16 = smov 0  }
   0x5 LB: > { %s395_s17 = sadd.s32 4294967295, %s631_s16   ;;  %s396_s18 = sadd.s32 4294967294, %s631_s16   ;;  %s631_s16 = sphi %s665_s16, %s15_s16   ;;  %s627_s15 = sphi %s663_s15, %s794_s15   ;;  %s623_s14 = sphi %s661_s14, %s793_s14   ;;  %s619_s13 = sphi %s659_s13, %s792_s13   ;;  %s615_s12 = sphi %s657_s12, %s791_s12   ;;  %s611_s11 = sphi %s655_s11, %s790_s11   ;;  %s607_s10 = sphi %s653_s10, %s789_s10   ;;  %s603_s9 = sphi %s651_s9, %s788_s9  }
   0x6   : > { %s24_s19 = sadd.s32 1, %s623_s14  ;;  %s27_s20 = sadd.s32 1, %s627_s15 }
   0x7   : > { %p25_p0 = scmp.ge.s32.totalorder %s24_s19, 4  ;;  %p98_p1 = scmp.ne.s32.totalorder %s611_s11, %s607_s10 }
   0x8   : > { %p99_p2 = scmp.eq.s32.totalorder %s395_s17, 7  ;;  %p104_p5 = scmp.ne.s32.totalorder %s607_s10, %s603_s9 }
   0x9   : > { %s796_s19 = smov (%p25_p0, %s24_s19), 0  ;;  %s798_s20 = smov (!%p25_p0, %s27_s20), %s627_s15 }
   0xa   : > { %s84_s21 = ssub.s32 %s623_s14, %s796_s19  ;;  %p702_p3 = por %p99_p2, %p98_p1 }
   0xb   : > { %p29_p4 = scmp.ge.s32.totalorder %s798_s20, 2  ;;  %p105_p6 = scmp.eq.s32.totalorder %s396_s18, 7 }
   0xc   : > { %p399_p7 = scmp.ge.s32.totalorder %s631_s16, 1  ;;  %p141_p9 = scmp.lt.s32.totalorder %s631_s16, 9 }
   0xd   : > { %s800_s20 = smov (%p29_p4, %s798_s20), 0  ;;  %p711_p8 = por %p105_p6, %p104_p5 }
   0xe   : > { %s83_s24 = ssub.s32 %s627_s15, %s800_s20  ;;  %s88_s25 = sadd.s32 1, %s611_s11 }
   0xf   : > { %s85_s26 = sor.u32 %s84_s21, %s83_s24  ;;  %p142_p10 = pnand %p399_p7, %p141_p9 }
  0x10   : > { %p86_p11 = scmp.eq.s32.totalorder %s85_s26, 0  ;;  %s403_s28 = sshll.u32 (!%p142_p10), %s615_s12, 4 }
  0x11   : > { %145 = sbr.rel (%p142_p10) target bundleno = 231 (0xe7), region = 28  ;;  %p175_p12 = scmp.lt.s32.totalorder (!%p142_p10), %s403_s28, 63 }
  0x12   : > { %s720_s27 = scalar_select %p86_p11, %s611_s11, %s88_s25  }
  0x13   : > { %s401_s5 = sshll.u32 (!%p142_p10), %s619_s13, 1  ;;  %s457_s18 = sshll.u32 (!%p142_p10), %s619_s13, 3 }
  0x14   : > { %p169_p13 = scmp.lt.s32.totalorder (!%p142_p10), %s401_s5, 3  ;;  %s165_s21 = sand.u32 (!%p142_p10), 1, %s607_s10  }
  0x15   : > { %s302_s24 = sadd.s32 (!%p142_p10), %s615_s12, %s457_s18  ;;  %s400_s25 = sshll.u32 (!%p142_p10), %s165_s21, 3 }
  0x16   : > { %s802_s28 = smov (!%p175_p12, %s403_s28), 63  ;;  %vm244_vm0 = vcmask 523264   ;;  %s804_s5 = smov (!%p169_p13, %s401_s5), 3 }
  0x17   : > { %s404_s29 = sshll.u32 %s802_s28, 2  ;;  %s402_s6 = sshll.u32 %s804_s5, 2 }
  0x18   : > { %s178_s4 = scalar_lea.vmem %s784_s1, %s404_s29  ;;  %s172_s17 = scalar_lea.vmem %s783_s0, %s402_s6 }
  0x19   : > { %v456_v0 = vld [vmem:[%s178_s4 + $0x38] sm:$0xff]  ;;  %v455_v2 = vld [vmem:[%s178_s4 + $0x30] sm:$0xff]  ;;  %v454_v4 = vld [vmem:[%s178_s4 + $0x28] sm:$0xff]  ;;  %s445_s26 = sshll.u32 %s302_s24, 2  ;;  %s167_s3 = scalar_lea.vmem [#allocation2], %s400_s25 }
  0x1a   : > { %v270_v1 = vsel %vm244_vm0, %v456_v0, 0  ;;  %v267_v3 = vsel %vm244_vm0, %v455_v2, 0  ;;  %v264_v5 = vsel %vm244_vm0, %v454_v4, 0  ;;  %v453_v6 = vld [vmem:[%s178_s4 + $0x20] sm:$0xff]  ;;  %v452_v8 = vld [vmem:[%s178_s4 + $0x18] sm:$0xff]  ;;  %v451_v10 = vld [vmem:[%s178_s4 + $0x10] sm:$0xff]  ;;  %s304_s30 = scalar_lea.hbm %s785_s2, %s445_s26 }
  0x1b   : > { %272 = vmatpush.bf16.xpose.msra.mxu0 %v270_v1  ;;  %v261_v7 = vsel %vm244_vm0, %v453_v6, 0  ;;  %v258_v9 = vsel %vm244_vm0, %v452_v8, 0  ;;  %v255_v11 = vsel %vm244_vm0, %v451_v10, 0  ;;  %v450_v12 = vld [vmem:[%s178_s4 + $0x8] sm:$0xff]  ;;  %v449_v14 = vld [vmem:[%s178_s4] sm:$0xff]  ;;  %s305_s4 = sshll.u32 %s167_s3, 4  ;;  %s306_s4 = int_to_ptr.vmem [resolvable:$true] %s305_s4 }
  0x1c   : > { %v252_v13 = vsel %vm244_vm0, %v450_v12, 0  ;;  %v249_v15 = vsel %vm244_vm0, %v449_v14, 0  ;;  %v448_v16 = vld [vmem:[%s172_s17] sm:$0xff]  ;;  %s307_s5 = sshll.u32 %s304_s30, 4  ;;  %s291_s6 = scalar_lea.sflag [#allocation3], %s165_s21  ;;  %s308_s5 = int_to_ptr.hbm [resolvable:$true] %s307_s5 }
  0x1d   : > { %s551_s13 = sshra.s32 %s308_s5, 4  ;;  %s557_s17 = scalar_lea.hbm %s785_s2, 64  ;;  %s552_s13 = int_to_ptr.hbm [resolvable:$true] %s551_s13 }
  0x1e   : > { %s553_s12 = scalar_lea.hbm %s552_s13, 8  ;;  %p558_p4 = scmp.lt.s32.totalorder %s552_s13, %s785_s2 }
  0x1f   : > { %p554_p0 = scmp.ne.s32.totalorder %s552_s13, %s553_s12  ;;  %p559_p5 = scmp.lt.s32.totalorder %s557_s17, %s553_s12 }
  0x21   : > { %p555_p1 = pnand %p554_p0, %p702_p3  ;;  %p560_p6 = por %p559_p5, %p558_p4 }
  0x23   : > { %273 = vmatpush.bf16.xpose.msra.mxu0 %v267_v3  ;;  %p556_p2 = pneg %p555_p1 }
  0x25   : > { %p561_p7 = pnand %p560_p6, %p556_p2 }
  0x2b   : > { %274 = vmatpush.bf16.xpose.msra.mxu0 %v264_v5 }
  0x33   : > { %275 = vmatpush.bf16.xpose.msra.mxu0 %v261_v7 }
  0x3b   : > { %276 = vmatpush.bf16.xpose.msra.mxu0 %v258_v9 }
  0x43   : > { %277 = vmatpush.bf16.xpose.msra.mxu0 %v255_v11 }
  0x4b   : > { %278 = vmatpush.bf16.xpose.msra.mxu0 %v252_v13 }
  0x53   : > { %279 = vmatpush.bf16.xpose.msra.mxu0 %v249_v15 }
  0x5a   : > { %441 = vmatmul.msk.bf16.vlgmr.msra.gmra.mxu0 %vm244_vm0, %v448_v16 }
  0xd7   : > { %v281_v17 = vpop.f32.mrf.mxu0 }
  0xdf   : > { %v283_v18 = vpop.f32.mrf.mxu0 }
  0xe0   : > { %v461_v19 = vpack.c.bf16 %v283_v18, %v281_v17 }
  0xe2   : > { %462 = vst [vmem:[%s167_s3] sm:$0xff] %v461_v19  }
  0xe3   : > { %564 = shalt.err (!%p561_p7)
}
  0xe4   : > { %s633_s21 = smov 64   ;;  %s634_s25 = smov 256  }
  0xe5   : > { %s635_s26 = smov 4  }
  0xe6   : > { %463 = dma.vmem_to_hbm [thread:$0]  (%p702_p3), %s306_s4, 128, %s308_s5, %s291_s6, %s633_s21, %s634_s25, %s635_s26  }
  0xe7 PF: > { %p469_p9 = scmp.ge.s32.totalorder %s631_s16, 2  ;;  %s322_s28 = sand.u32 1, %s603_s9  }
  0xe8   : > { %s323_s29 = scalar_lea.sflag [#allocation3], %s322_s28 }
  0xe9   : > { %p466_p10 = pnand %p469_p9, %p711_p8 }
  0xeb   : > { %p467_p11 = pneg %p466_p10 }
  0xed   : > { %598 = dma.done.wait (%p467_p11), %s323_s29, 128  }
  0xee   : > { %600 = vsyncadd (%p467_p11), %s323_s29, 4294967168  ;;  %s15_s16 = sadd.s32 1, %s631_s16   ;;  %s788_s9 = smov %s607_s10 }
  0xef   : > { %p12_p12 = scmp.ge.s32.totalorder %s15_s16, 10   ;;  %s789_s10 = smov %s611_s11 }
  0xf0   : > { %s790_s11 = smov %s720_s27  ;;  %s791_s12 = smov %s623_s14 }
  0xf1   : > { %s792_s13 = smov %s627_s15  ;;  %s793_s14 = smov %s796_s19 }
  0xf2   : > { %s794_s15 = smov %s800_s20  ;;  %14 = sbr.rel (!%p12_p12) target bundleno = 5 (0x5), region = 66 }
  0xf7   :  { %329 = vsyncpa [#allocation3], 1 }
  0xf8   :  { %331 = vsyncpa [#allocation3 + $0x1], 1 }

</bundles_post_ra>
